<compile_context>
chip_gen: v7x
topology: tpu7x:2x2x1
jax: 0.10.0
libtpu: 0.0.40
codegen_flags: <defaults>
</compile_context>

<pallas_src>
import functools

import jax
import jax.numpy as jnp
from jax import lax
from jax.experimental import pallas as pl
from jax.experimental.pallas import tpu as pltpu


def _round_up(x: int, m: int) -> int:
    return (x + m - 1) // m * m


def _cdiv(a: int, b: int) -> int:
    return (a + b - 1) // b


def _vmem_budget_bytes() -> int:
    """Per-core VMEM budget for this kernel (works on v5e/v6e/v7x)."""
    phys = 64 * 1024 * 1024          # v7x per-TC physical VMEM (smallest case)
    try:
        info = pltpu.get_tpu_info()
        phys = int(getattr(info, "vmem_capacity_bytes", phys)) or phys
    except Exception:
        pass
    # 25% headroom for compiler temporaries; never request more than 96 MiB.
    return int(min((phys * 3) // 4, 96 * 1024 * 1024))


def _ff_kernel(x_ref, w1_ref, b1_ref, w2_ref, b2_ref, w3_ref, b3_ref, o_ref,
               *, scalar_head: bool, tile_rows: int, chunk: int):
    # Hoist weight/bias loads out of the chunk loop (JAX does not CSE them).
    w1 = w1_ref[...]
    b1 = b1_ref[...]
    w2 = w2_ref[...]
    b2 = b2_ref[...]
    w3 = w3_ref[...]
    b3 = b3_ref[...]

    def process(r: int, rows: int):
        # Layers 1-2: MXU matmul with f32 accumulation; bias add + ReLU stay f32
        # on the VPU (fast path on v5e).  Chunk-sized intermediates only.
        xc = x_ref[pl.ds(r, rows), :]
        h = jnp.dot(xc, w1, preferred_element_type=jnp.float32)
        h = jnp.maximum(h + b1, 0.0)
        h = jnp.dot(h.astype(w2.dtype), w2, preferred_element_type=jnp.float32)
        h = jnp.maximum(h + b2, 0.0)
        if scalar_head:
            # out_dim == 1: produce a lane-dense (1, rows) row directly with a
            # trans-B matmul  w3(1,h2) . h(rows,h2)^T  (f32 operands, f32 acc).
            row = lax.dot_general(w3, h, (((1,), (1,)), ((), ())),
                                  preferred_element_type=jnp.float32) + b3
            o_ref[0, :, pl.ds(r, rows)] = row.astype(o_ref.dtype)
        else:
            out = jnp.dot(h.astype(w3.dtype), w3,
                          preferred_element_type=jnp.float32) + b3
            o_ref[pl.ds(r, rows), :] = out.astype(o_ref.dtype)

    n_full, rem = divmod(tile_rows, chunk)
    for c in range(n_full):              # static offsets -> free slicing
        process(c * chunk, chunk)
    if rem:                              # static remainder chunk (multiple of 8)
        process(n_full * chunk, rem)


def _auto_tiling(batch, in_dim, hid1, hid2, out_dim, comp_itemsize, w3_itemsize,
                 block_batch, budget):
    """Pick (tile_rows, num_tiles, padded_batch, chunk) from the VMEM budget."""
    pad128 = lambda n: _round_up(max(int(n), 1), 128)
    chunk_target = 512

    # Resident (constant index_map) weights/biases; x2 for double buffering.
    resident = 2 * ((in_dim * hid1 + hid1 * hid2) * comp_itemsize
                    + hid2 * out_dim * w3_itemsize
                    + (hid1 + hid2 + out_dim) * 4)
    # Chunk-sized temporaries inside the kernel body (x / h1 / h2 / head), f32.
    per_chunk = chunk_target * (pad128(in_dim) + pad128(hid1) + pad128(hid2)
                                + pad128(out_dim)) * 4
    # Per-tile-row cost: double-buffered X block + double-buffered output block.
    per_row = 2 * in_dim * comp_itemsize + 2 * max(out_dim, 1) * 4 + 8

    avail = budget - resident - per_chunk - (2 << 20)   # 2 MiB safety margin
    if avail > 8 * per_row:
        tb_cap = (avail // per_row) // 8 * 8
    else:
        tb_cap = 8
    tb_cap = max(8, min(int(tb_cap), block_batch))

    # Minimum grid steps: >=2 (even) so both v7x TensorCores get work,
    # >=4 at large batch so X prefetch of step i+1 hides behind compute of i.
    min_tiles = 1
    if batch > 8:
        min_tiles = 2
    if batch >= 4096:
        min_tiles = 4
    num_tiles = max(_cdiv(batch, tb_cap), min_tiles)
    if num_tiles > 1:
        num_tiles = _round_up(num_tiles, 2)

    tb = _round_up(_cdiv(batch, num_tiles), 8)   # <= 7 padded rows per tile
    padded = num_tiles * tb
    chunk = min(chunk_target, tb)
    return tb, num_tiles, padded, chunk


def probing_model_feedforward(x, params, *, block_batch: int = 8192,
                              compute_dtype=jnp.bfloat16,
                              include_batch_norm: bool = False,
                              dropout: float = 0.0):
    """Fused feedforward probing model.

    x: (batch, input_dim) float32
    params: dict with w1,b1,w2,b2,w3,b3; weights stored as (in, out), biases (1, out)
    Returns: (batch,) if output_dim == 1 else (batch, output_dim)   [squeeze(-1)]
    """
    if include_batch_norm or dropout > 0.0:
        # TODO(synk): BatchNorm / Dropout layer variants are not implemented.
        raise NotImplementedError(
            "include_batch_norm=True / dropout>0.0 are not supported by this kernel")

    w1, b1 = params["w1"], params["b1"]
    w2, b2 = params["w2"], params["b2"]
    w3, b3 = params["w3"], params["b3"]

    batch, in_dim = x.shape
    hid1 = w1.shape[1]
    hid2 = w2.shape[1]
    out_dim = w3.shape[1]
    scalar_head = (out_dim == 1)

    comp_itemsize = jnp.dtype(compute_dtype).itemsize
    w3_itemsize = 4 if scalar_head else comp_itemsize
    budget = _vmem_budget_bytes()
    tb, num_tiles, padded, chunk = _auto_tiling(
        batch, in_dim, hid1, hid2, out_dim, comp_itemsize, w3_itemsize,
        block_batch, budget)

    if padded != batch:
        x = jnp.pad(x, ((0, padded - batch), (0, 0)))

    # MXU operands in compute_dtype (bf16 halves HBM traffic for X, the dominant
    # DMA, at native MXU rate).  Biases (and the out_dim==1 head weights) stay
    # f32: they feed the f32 accumulators / the f32 head matmul.
    x_c = x.astype(compute_dtype)
    w1_c = w1.astype(compute_dtype)
    w2_c = w2.astype(compute_dtype)
    b1_c = b1.astype(jnp.float32)
    b2_c = b2.astype(jnp.float32)
    b3_c = b3.astype(jnp.float32)
    if scalar_head:
        w3_c = w3.astype(jnp.float32).reshape(1, hid2)
        # Lane-dense output: batch rows live on the lane axis of a (1, tb) row
        # per tile.  3-D shape so the block's last two dims equal the array dims.
        out_shape = jax.ShapeDtypeStruct((num_tiles, 1, tb), jnp.float32)
        out_spec = pl.BlockSpec((1, 1, tb), lambda i: (i, 0, 0))
    else:
        w3_c = w3.astype(compute_dtype)
        out_shape = jax.ShapeDtypeStruct((padded, out_dim), jnp.float32)
        out_spec = pl.BlockSpec((tb, out_dim), lambda i: (i, 0))

    # Weights/biases: constant index_map -> fetched once, VMEM-resident.
    resident = lambda shape: pl.BlockSpec(shape, lambda i: (0,) * len(shape))

    out = pl.pallas_call(
        functools.partial(_ff_kernel, scalar_head=scalar_head,
                          tile_rows=tb, chunk=chunk),
        out_shape=out_shape,
        grid=(num_tiles,),
        in_specs=[
            pl.BlockSpec((tb, in_dim), lambda i: (i, 0)),   # batch-tiled, pipelined
            resident(w1_c.shape), resident(b1_c.shape),
            resident(w2_c.shape), resident(b2_c.shape),
            resident(w3_c.shape), resident(b3_c.shape),
        ],
        out_specs=out_spec,
        compiler_params=pltpu.CompilerParams(
            # Batch tiles are independent -> shard over both v7x TensorCores.
            dimension_semantics=("parallel",),
            vmem_limit_bytes=budget,
        ),
    )(x_c, w1_c, b1_c, w2_c, b2_c, w3_c, b3_c)

    if scalar_head:                 # squeeze(-1) semantics of the PyTorch module
        return out.reshape(padded)[:batch]
    return out[:batch]


def init_params(key, input_dim, hidden_layer_dims, output_dim):
    """Deterministic init mirroring torch.nn.Linear's default (Kaiming-uniform-ish)."""
    dims = [input_dim, *hidden_layer_dims, output_dim]
    params = {}
    names = ["1", "2", "3"]
    assert len(dims) - 1 == len(names)
    for i, name in enumerate(names):
        fan_in, fan_out = dims[i], dims[i + 1]
        key, kw, kb = jax.random.split(key, 3)
        bound = 1.0 / (fan_in ** 0.5)
        # stored as (in, out) so the kernel computes x @ W
        params[f"w{name}"] = jax.random.uniform(
            kw, (fan_in, fan_out), jnp.float32, -bound, bound)
        params[f"b{name}"] = jax.random.uniform(
            kb, (1, fan_out), jnp.float32, -bound, bound)
    return params


if __name__ == "__main__":
    key = jax.random.PRNGKey(0)

    def reference(x, params):
        hp = jax.lax.Precision.HIGHEST
        h = jnp.maximum(jnp.dot(x, params["w1"], precision=hp) + params["b1"], 0.0)
        h = jnp.maximum(jnp.dot(h, params["w2"], precision=hp) + params["b2"], 0.0)
        out = jnp.dot(h, params["w3"], precision=hp) + params["b3"]
        return out[..., 0] if out.shape[-1] == 1 else out

    # --- Small demo config (single tile, single chunk) ---
    batch, input_dim = 8, 32
    hidden_layer_dims = (64, 32)
    output_dim = 1  # squeeze(-1) then yields shape (batch,)

    k_x, k_p, k_x2, k_p2 = jax.random.split(key, 4)
    x = jax.random.normal(k_x, (batch, input_dim), jnp.float32)
    params = init_params(k_p, input_dim, hidden_layer_dims, output_dim)
    ref = reference(x, params)

    # f32-operand kernel path (true f32 math everywhere).
    out_f32 = jax.block_until_ready(
        probing_model_feedforward(x, params, compute_dtype=jnp.float32))
    assert out_f32.shape == (batch,), out_f32.shape
    assert jnp.allclose(out_f32, ref, atol=1e-2, rtol=1e-2)

    # Default bf16-MXU path (halved HBM traffic); looser tolerance since the
    # matmul operands are truncated to bf16.
    out_bf16 = jax.block_until_ready(probing_model_feedforward(x, params))
    assert out_bf16.shape == (batch,), out_bf16.shape
    assert jnp.allclose(out_bf16, ref, atol=5e-2, rtol=5e-2)

    # --- Moderate config: exercises the multi-tile grid, the lane-dense output
    #     layout, and the in-kernel remainder chunk (tb=656 -> chunks 512 + 144).
    batch2, input_dim2 = 1300, 128
    x2 = jax.random.normal(k_x2, (batch2, input_dim2), jnp.float32)
    params2 = init_params(k_p2, input_dim2, (64, 32), 1)
    ref2 = reference(x2, params2)
    out2 = jax.block_until_ready(
        probing_model_feedforward(x2, params2, compute_dtype=jnp.float32))
    assert out2.shape == (batch2,), out2.shape
    assert jnp.allclose(out2, ref2, atol=1e-2, rtol=1e-2)

    print("KERNEL_OK")
</pallas_src>

<mosaic_0001>
module attributes {stable_mosaic.version = 11 : i64} {
  func.func @_ff_kernel(%arg0: i32, %arg1: memref<8x32xf32, #tpu.memory_space<vmem>>, %arg2: memref<32x64xf32, #tpu.memory_space<vmem>>, %arg3: memref<1x64xf32, #tpu.memory_space<vmem>>, %arg4: memref<64x32xf32, #tpu.memory_space<vmem>>, %arg5: memref<1x32xf32, #tpu.memory_space<vmem>>, %arg6: memref<1x32xf32, #tpu.memory_space<vmem>>, %arg7: memref<1x1xf32, #tpu.memory_space<vmem>>, %arg8: memref<1x1x8xf32, #tpu.memory_space<vmem>>) attributes {dimension_semantics = [#tpu.dimension_semantics<parallel>], iteration_bounds = array<i64: 1>, scalar_prefetch = 0 : i64, scratch_operands = 0 : i64, tpu.core_type = #tpu.core_type<tc>, window_params = [{transform_indices = @transform_0, window_bounds = array<i64: 8, 32>}, {pipeline_mode = #tpu.pipeline_mode<synchronous>, transform_indices = @transform_1, window_bounds = array<i64: 32, 64>}, {pipeline_mode = #tpu.pipeline_mode<synchronous>, transform_indices = @transform_2, window_bounds = array<i64: 1, 64>}, {pipeline_mode = #tpu.pipeline_mode<synchronous>, transform_indices = @transform_3, window_bounds = array<i64: 64, 32>}, {pipeline_mode = #tpu.pipeline_mode<synchronous>, transform_indices = @transform_4, window_bounds = array<i64: 1, 32>}, {pipeline_mode = #tpu.pipeline_mode<synchronous>, transform_indices = @transform_5, window_bounds = array<i64: 1, 32>}, {pipeline_mode = #tpu.pipeline_mode<synchronous>, transform_indices = @transform_6, window_bounds = array<i64: 1, 1>}, {transform_indices = @transform_7, window_bounds = array<i64: 1, 1, 8>}]} {
    %c0 = arith.constant 0 : index
    %c0_0 = arith.constant 0 : index
    %0 = vector.load %arg2[%c0, %c0_0] : memref<32x64xf32, #tpu.memory_space<vmem>>, vector<32x64xf32>
    %c0_1 = arith.constant 0 : index
    %c0_2 = arith.constant 0 : index
    %1 = vector.load %arg3[%c0_1, %c0_2] : memref<1x64xf32, #tpu.memory_space<vmem>>, vector<1x64xf32>
    %c0_3 = arith.constant 0 : index
    %c0_4 = arith.constant 0 : index
    %2 = vector.load %arg4[%c0_3, %c0_4] : memref<64x32xf32, #tpu.memory_space<vmem>>, vector<64x32xf32>
    %c0_5 = arith.constant 0 : index
    %c0_6 = arith.constant 0 : index
    %3 = vector.load %arg5[%c0_5, %c0_6] : memref<1x32xf32, #tpu.memory_space<vmem>>, vector<1x32xf32>
    %c0_7 = arith.constant 0 : index
    %c0_8 = arith.constant 0 : index
    %4 = vector.load %arg6[%c0_7, %c0_8] : memref<1x32xf32, #tpu.memory_space<vmem>>, vector<1x32xf32>
    %c0_9 = arith.constant 0 : index
    %c0_10 = arith.constant 0 : index
    %5 = vector.load %arg7[%c0_9, %c0_10] : memref<1x1xf32, #tpu.memory_space<vmem>>, vector<1x1xf32>
    %c0_11 = arith.constant 0 : index
    %c0_12 = arith.constant 0 : index
    %6 = vector.load %arg1[%c0_11, %c0_12] : memref<8x32xf32, #tpu.memory_space<vmem>>, vector<8x32xf32>
    %cst = arith.constant dense<0.000000e+00> : vector<8x64xf32>
    %7 = tpu.matmul %6, %0, %cst {dimension_numbers = #tpu.dot_dimension_numbers<[1], [0], [0], [1], [0, 0, 1, 1], [], []>} : vector<8x32xf32>, vector<32x64xf32>, vector<8x64xf32> -> vector<8x64xf32>
    %8 = vector.broadcast %1 : vector<1x64xf32> to vector<8x64xf32>
    %9 = arith.addf %7, %8 : vector<8x64xf32>
    %cst_13 = arith.constant 0.000000e+00 : f32
    %10 = vector.broadcast %cst_13 : f32 to vector<8x64xf32>
    %11 = arith.maximumf %9, %10 : vector<8x64xf32>
    %cst_14 = arith.constant dense<0.000000e+00> : vector<8x32xf32>
    %12 = tpu.matmul %11, %2, %cst_14 {dimension_numbers = #tpu.dot_dimension_numbers<[1], [0], [0], [1], [0, 0, 1, 1], [], []>} : vector<8x64xf32>, vector<64x32xf32>, vector<8x32xf32> -> vector<8x32xf32>
    %13 = vector.broadcast %3 : vector<1x32xf32> to vector<8x32xf32>
    %14 = arith.addf %12, %13 : vector<8x32xf32>
    %cst_15 = arith.constant 0.000000e+00 : f32
    %15 = vector.broadcast %cst_15 : f32 to vector<8x32xf32>
    %16 = arith.maximumf %14, %15 : vector<8x32xf32>
    %cst_16 = arith.constant dense<0.000000e+00> : vector<1x8xf32>
    %17 = tpu.matmul %4, %16, %cst_16 {dimension_numbers = #tpu.dot_dimension_numbers<[1], [1], [0], [0], [0, 0, 1, 0], [], []>} : vector<1x32xf32>, vector<8x32xf32>, vector<1x8xf32> -> vector<1x8xf32>
    %18 = vector.broadcast %5 : vector<1x1xf32> to vector<1x8xf32>
    %19 = arith.addf %17, %18 : vector<1x8xf32>
    %c0_17 = arith.constant 0 : index
    %c0_18 = arith.constant 0 : index
    %c0_19 = arith.constant 0 : index
    %20 = vector.load %arg8[%c0_17, %c0_18, %c0_19] : memref<1x1x8xf32, #tpu.memory_space<vmem>>, vector<1x1x8xf32>
    %21 = vector.shape_cast %20 : vector<1x1x8xf32> to vector<1x8xf32>
    %22 = vector.shape_cast %19 : vector<1x8xf32> to vector<1x1x8xf32>
    tpu.vector_store %arg8[%c0_17, %c0_18, %c0_19], %22 {strides = array<i32>} : memref<1x1x8xf32, #tpu.memory_space<vmem>>, vector<1x1x8xf32>,
    return
  }
  func.func @transform_0(%arg0: i32) -> (i32, i32) {
    %c0_i32 = arith.constant 0 : i32
    %c0_i32_0 = arith.constant 0 : i32
    return %arg0, %c0_i32 : i32, i32
  }
  func.func @transform_1(%arg0: i32) -> (i32, i32) {
    %c0_i32 = arith.constant 0 : i32
    %c0_i32_0 = arith.constant 0 : i32
    %c0_i32_1 = arith.constant 0 : i32
    return %c0_i32, %c0_i32_0 : i32, i32
  }
  func.func @transform_2(%arg0: i32) -> (i32, i32) {
    %c0_i32 = arith.constant 0 : i32
    %c0_i32_0 = arith.constant 0 : i32
    %c0_i32_1 = arith.constant 0 : i32
    return %c0_i32, %c0_i32_0 : i32, i32
  }
  func.func @transform_3(%arg0: i32) -> (i32, i32) {
    %c0_i32 = arith.constant 0 : i32
    %c0_i32_0 = arith.constant 0 : i32
    %c0_i32_1 = arith.constant 0 : i32
    return %c0_i32, %c0_i32_0 : i32, i32
  }
  func.func @transform_4(%arg0: i32) -> (i32, i32) {
    %c0_i32 = arith.constant 0 : i32
    %c0_i32_0 = arith.constant 0 : i32
    %c0_i32_1 = arith.constant 0 : i32
    return %c0_i32, %c0_i32_0 : i32, i32
  }
  func.func @transform_5(%arg0: i32) -> (i32, i32) {
    %c0_i32 = arith.constant 0 : i32
    %c0_i32_0 = arith.constant 0 : i32
    %c0_i32_1 = arith.constant 0 : i32
    return %c0_i32, %c0_i32_0 : i32, i32
  }
  func.func @transform_6(%arg0: i32) -> (i32, i32) {
    %c0_i32 = arith.constant 0 : i32
    %c0_i32_0 = arith.constant 0 : i32
    %c0_i32_1 = arith.constant 0 : i32
    return %c0_i32, %c0_i32_0 : i32, i32
  }
  func.func @transform_7(%arg0: i32) -> (i32, i32, i32) {
    %c0_i32 = arith.constant 0 : i32
    %c0_i32_0 = arith.constant 0 : i32
    %c0_i32_1 = arith.constant 0 : i32
    return %arg0, %c0_i32, %c0_i32_0 : i32, i32, i32
  }
}

</mosaic_0001>

<bundles_post_ra>
// kernel: tpu_custom_call.1
= control target key start
LH: loop header
LB: loop body
LE: loop exit
PB: predicated region body
PF: predicated region fallthrough
CT: control target
= control target key end

     0   :  { %s528_s0 = inlined_call_operand.vmem [shape: f32[8,32], index: 0, kind: input, shape index: {}]   ;;  %s529_s1 = inlined_call_operand.vmem [shape: f32[32,64], index: 1, kind: input, shape index: {}]   ;;  %s530_s2 = inlined_call_operand.vmem [shape: f32[1,64], index: 2, kind: input, shape index: {}]   ;;  %s531_s3 = inlined_call_operand.vmem [shape: f32[64,32], index: 3, kind: input, shape index: {}]   ;;  %s532_s4 = inlined_call_operand.vmem [shape: f32[1,32], index: 4, kind: input, shape index: {}]   ;;  %s533_s5 = inlined_call_operand.vmem [shape: f32[1,32], index: 5, kind: input, shape index: {}]   ;;  %s534_s6 = inlined_call_operand.<no memory space> [shape: f32[1,1], index: 6, kind: input, shape index: {}]   ;;  %s535_s7 = inlined_call_operand.hbm [shape: f32[1,1,8], index: 7, kind: output, shape index: {}]  }
   0x1   :  { %v12_v0 = vstv %s534_s6 }
   0x2   :  { %13 = vst [vmem:[#allocation2] sm:$0x1] %v12_v0 }
   0x3   :  { %v29_v1 = vld [vmem:[%s529_s1] sm:$0xff]  ;;  %v30_v2 = vld [vmem:[%s529_s1 + $0x8] sm:$0xff]  ;;  %v31_v3 = vld [vmem:[%s529_s1 + $0x10] sm:$0xff]  ;;  %v414_v4 = vmov 0.0|0.0   ;;  %vm415_vm0 = vmmov 0   ;;  %v416_v7 = vmov 0.0  }
   0x4   :  { %366 = vmatprep.subr.bf16.mxu0 %v414_v4  ;;  %v367_v5 = vpack.c.bf16 %v30_v2, %v29_v1  ;;  %v32_v6 = vld [vmem:[%s529_s1 + $0x18] sm:$0xff]  ;;  %339 = vmatprep.mubr.msk.f32.mxu0 %vm415_vm0, %v416_v7  ;;  %v34_v8 = vld [vmem:[%s531_s3] sm:$0xff]  ;;  %v35_v9 = vld [vmem:[%s531_s3 + $0x8] sm:$0xff] }
   0x5   :  { %372 = vmatprep.subr.bf16.mxu1 %v414_v4  ;;  %v36_v10 = vld [vmem:[%s531_s3 + $0x10] sm:$0xff]  ;;  %v37_v11 = vld [vmem:[%s531_s3 + $0x18] sm:$0xff]  ;;  %358 = vmatprep.mubr.msk.f32.mxu1 %vm415_vm0, %v416_v7  ;;  %v370_v12 = vpack.c.bf16 %v32_v6, %v31_v3  ;;  %v373_v13 = vpack.c.bf16 %v35_v9, %v34_v8 }
   0x6   :  { %368 = vmatpush3.bf16.msra.mxu0 %v367_v5 }
   0x7   :  { %369 = vmatprep.subr.bf16.mxu0 %v414_v4 }
   0x8   :  { %14 = vsyncpa [#allocation4], 0  ;;  %374 = vmatpush3.bf16.msra.mxu1 %v373_v13  ;;  %v376_v14 = vpack.c.bf16 %v37_v11, %v36_v10  ;;  %v38_v15 = vld [vmem:[%s531_s3 + $0x20] sm:$0xff]  ;;  %v39_v16 = vld [vmem:[%s531_s3 + $0x28] sm:$0xff]  ;;  %vm52_vm1 = vcmask 261120   ;;  %vm133_vm2 = vcmask 523264   ;;  %v213_v35 = vlaneseq }
   0x9   :  { %375 = vmatprep.subr.bf16.mxu1 %v414_v4  ;;  %v45_v17 = vld [vmem:[%s528_s0] sm:$0xff]  ;;  %v379_v18 = vpack.c.bf16 %v39_v16, %v38_v15  ;;  %v40_v19 = vld [vmem:[%s531_s3 + $0x30] sm:$0xff]  ;;  %v41_v20 = vld [vmem:[%s531_s3 + $0x38] sm:$0xff]  ;;  %v417_v28 = vmov 0   ;;  %s418_s30 = smov [#allocation3]   ;;  %vm293_vm3 = vcmask 57344  }
   0xa   :  { %371 = vmatpush3.bf16.msra.mxu0 %v370_v12  ;;  %v382_v21 = vpack.c.bf16 %v41_v20, %v40_v19  ;;  %v309_v22 = vld [vmem:[%s530_s2] ss:$0 sm:$0xff]  ;;  %389 = vset.pattern.permute.xlu0 %v417_v28  ;;  %v214_v36 = vshrl.u32 %v213_v35, 7  ;;  %s301_s8 = sshll.u32 %s418_s30, 4  ;;  %s302_s8 = int_to_ptr.vmem [resolvable:$true] %s301_s8 }
   0xb   :  { %361 = vmatprep.subr.mxu0 %v416_v7  ;;  %v44_v27 = vld [vmem:[#allocation2] sm:$0x1]  ;;  %s394_s9 = scalar_lea.vmem %s302_s8, 32  ;;  %p395_p1 = scmp.lt.s32.totalorder %s302_s8, %s302_s8 }
   0xc   :  { %377 = vmatpush3.bf16.msra.mxu1 %v376_v14  ;;  %210 = vperm.xlu0 %389, %v44_v27   ;;  %v311_v29 = vld [vmem:[%s532_s4] ss:$0 sm:$0xff]  ;;  %v215_v37 = vsub.s32 0, %v214_v36  ;;  %s390_s4 = scalar_lea.vmem %s302_s8, 16 }
   0xd   :  { %340 = vmatmul.mubr.msk.f32.vlgmr.msra.gmra.mrb[0].mxu0 %vm52_vm1, %v45_v17  ;;  %378 = vmatprep.subr.bf16.mxu1 %v414_v4  ;;  %v43_v34 = vld [vmem:[%s533_s5] sm:$0x1]  ;;  %p391_p0 = scmp.ne.s32.totalorder %s302_s8, %s390_s4  ;;  %p396_p2 = scmp.lt.s32.totalorder %s394_s9, %s390_s4 }
   0xe   :  { %363 = vmatprep.mubr.msk.f32.mxu0 %vm415_vm0, %v416_v7 }
   0xf   :  { %p397_p3 = por %p396_p2, %p395_p1 }
  0x10   :  { %380 = vmatpush3.bf16.msra.mxu1 %v379_v18 }
  0x11   :  { %381 = vmatprep.subr.bf16.mxu1 %v414_v4  ;;  %p398_p4 = pnand %p397_p3, %p391_p0 }
  0x14   :  { %383 = vmatpush3.bf16.msra.mxu1 %v382_v21 }
  0x8b   :  { %v211_v38 = vpop.permute.xlu0 %210 }
  0x8c   :  { %v216_v39 = vrot.slane %v211_v38, %v215_v37 }
  0xe0   :  { %v122_v23 = vpop.f32.mrb[0].mxu0 }
  0xe1   :  { %v123_v24 = vadd.f32 %v309_v22, %v122_v23  ;;  %v341_v25 = vpop.f32.mrb[1].mxu0 }
  0xe3   :  { %v126_v26 = vmax.f32 %v123_v24, 0.0 }
  0xe5   :  { %359 = vmatmul.mubr.msk.f32.vlgmr.msra.gmra.mrb[0].mxu1 %vm133_vm2, %v126_v26 }
 0x1b8   :  { %v203_v30 = vpop.f32.mrb[0].mxu1 }
 0x1b9   :  { %v204_v31 = vadd.f32 %v311_v29, %v203_v30  ;;  %v360_v32 = vpop.f32.mrb[1].mxu1 }
 0x1bb   :  { %v207_v33 = vmax.f32 %v204_v31, 0.0 }
 0x1bd   :  { %362 = vmatpush3.xpose.msk.msra.mxu0 %vm52_vm1, %v207_v33 }
 0x1c0   :  { %364 = vmatmul.mubr.msk.f32.vlgmr.msra.gmra.mrb[2].mxu0 %vm52_vm1, %v43_v34 }
 0x293   :  { %v289_v40 = vpop.f32.mrb[2].mxu0 }
 0x294   :  { %v290_v41 = vadd.f32 %v289_v40, %v216_v39  ;;  %v365_v42 = vpop.f32.mrb[3].mxu0 }
 0x296   :  { %294 = vst.msk [vmem:[#allocation3] sm:$0x1] %vm293_vm3, %v290_v41 }
 0x297   :  { %401 = shalt.err (!%p398_p4)
}
 0x298   :  { %s402_s6 = scalar_lea.hbm %s535_s7, 16 }
 0x299   :  { %p403_p5 = scmp.ne.s32.totalorder %s535_s7, %s402_s6  ;;  %p406_p6 = scmp.lt.u32.totalorder %s402_s6, %s535_s7 }
 0x29b   :  { %p408_p7 = pnand %p406_p6, %p403_p5 }
 0x29d   :  { %411 = shalt.err (!%p408_p7)
}
 0x29e   :  { %304 = dma.vmem_to_hbm [thread:$0]  %s302_s8, 16, %s535_s7, [#allocation4]  }
 0x29f   :  { %412 = dma.done.wait [#allocation4], 16  }
 0x2a0   :  { %413 = vsyncadd [#allocation4], 4294967280 }
 0x2a1   :  { %308 = vsyncpa [#allocation4], 1 }

</bundles_post_ra>
